<compile_context>
chip_gen: v7x
topology: tpu7x:2x2x1
jax: 0.10.0
libtpu: 0.0.40
codegen_flags: <defaults>
</compile_context>

<pallas_src>
import jax
import jax.numpy as jnp
from jax.experimental import pallas as pl
from jax.experimental.pallas import tpu as pltpu


def _round_up(n, m):
    return ((n + m - 1) // m) * m


def ncf_kernel(uidx_ref, iidx_ref,                 # scalar-prefetch indices (SMEM)
               utab_ref, itab_ref,                 # VMEM-resident embedding tables
               w1t_ref, b1_ref, w2_ref,            # VMEM-resident weights
               slab_ref):                          # [TB, SLAB_W] output block
    TB, SLAB_W = slab_ref.shape
    K = utab_ref.shape[1]
    base = pl.program_id(0) * TB

    # ---- in-kernel row gather: table rows -> output slab lanes [0 : 2K] ----
    # Static store offsets (unrolled), dynamic sublane-offset reads from the
    # VMEM tables.  No DMAs, no semaphores, no waits.
    for r in range(TB):
        u = uidx_ref[base + r]
        slab_ref[r:r + 1, 0:K] = utab_ref[pl.ds(u, 1), :]
        i = iidx_ref[base + r]
        slab_ref[r:r + 1, K:2 * K] = itab_ref[pl.ds(i, 1), :]

    # ---- linear1: one MXU matmul against full W1^T [2K, K] (concat is free,
    # the gathered halves already sit contiguously in the slab lanes) --------
    z = slab_ref[:, 0:2 * K]                                         # [TB, 2K]
    h1 = jnp.dot(z, w1t_ref[...], preferred_element_type=jnp.float32)
    h1 = jnp.maximum(h1 + b1_ref[...], 0.0)                          # [TB, K]

    # ---- linear2 (no bias): VPU multiply + lane reduce (avoid N=1 matmul) --
    out_col = jnp.sum(h1 * w2_ref[...], axis=-1, keepdims=True)      # [TB, 1]
    slab_ref[:, 2 * K:2 * K + 1] = out_col

    # ---- zero only the pad lanes; everything else is already written -------
    pad = SLAB_W - (2 * K + 1)
    if pad > 0:
        slab_ref[:, 2 * K + 1:] = jnp.zeros((TB, pad), dtype=slab_ref.dtype)


def ncf_forward(x, user_table, item_table, w1, b1, w2):
    """x: [B,2] int (user_idx, item_idx). Weights in PyTorch convention:
    w1 [K,2K], b1 [K], w2 [1,K]. Returns (out [B,1], user_embed [B,K], item_embed [B,K])."""
    B = x.shape[0]
    K = user_table.shape[1]

    # Batch tiling: block of up to 128 rows (the gather loop is unrolled, so
    # cap the block); >=2 blocks at large B lets "parallel" shard across TCs.
    TB = min(128, _round_up(B, 8))
    Bp = _round_up(B, TB)

    uidx = jnp.zeros((Bp,), jnp.int32).at[:B].set(x[:, 0].astype(jnp.int32))
    iidx = jnp.zeros((Bp,), jnp.int32).at[:B].set(x[:, 1].astype(jnp.int32))

    w1t = jnp.asarray(w1, jnp.float32).T                 # [2K, K]  (full W1^T)
    b1_2d = jnp.asarray(b1, jnp.float32)[None, :]        # [1, K]
    w2_row = jnp.asarray(w2, jnp.float32).reshape(1, K)  # [1, K]

    user_table = jnp.asarray(user_table, jnp.float32)
    item_table = jnp.asarray(item_table, jnp.float32)
    U, _ = user_table.shape
    I, _ = item_table.shape

    SLAB_W = _round_up(2 * K + 1, 128)                   # lane-dense output width

    slab = pl.pallas_call(
        ncf_kernel,
        out_shape=jax.ShapeDtypeStruct((Bp, SLAB_W), jnp.float32),
        grid_spec=pltpu.PrefetchScalarGridSpec(
            num_scalar_prefetch=2,
            grid=(Bp // TB,),
            in_specs=[
                pl.BlockSpec((U, K), lambda b, u, i: (0, 0)),       # user table (VMEM resident)
                pl.BlockSpec((I, K), lambda b, u, i: (0, 0)),       # item table (VMEM resident)
                pl.BlockSpec((2 * K, K), lambda b, u, i: (0, 0)),   # W1^T
                pl.BlockSpec((1, K), lambda b, u, i: (0, 0)),       # b1
                pl.BlockSpec((1, K), lambda b, u, i: (0, 0)),       # w2 row
            ],
            out_specs=pl.BlockSpec((TB, SLAB_W), lambda b, u, i: (b, 0)),
        ),
        compiler_params=pltpu.CompilerParams(
            dimension_semantics=("parallel",)),
    )(uidx, iidx, user_table, item_table, w1t, b1_2d, w2_row)

    ue = slab[:B, 0:K]
    ie = slab[:B, K:2 * K]
    out = slab[:B, 2 * K:2 * K + 1]
    return out, ue, ie


def ncf_reference(x, user_table, item_table, w1, b1, w2):
    ue = user_table[x[:, 0]]
    ie = item_table[x[:, 1]]
    z = jnp.concatenate([ue, ie], axis=1)
    h1 = jax.nn.relu(z @ w1.T + b1)
    out = h1 @ w2.T
    return out, ue, ie


if __name__ == "__main__":
    num_users, num_items, K = 32, 48, 32
    B = 8

    key = jax.random.PRNGKey(0)
    k_ut, k_it, k_w1, k_b1, k_w2, k_x = jax.random.split(key, 6)

    # Deterministic synthetic parameters (shapes match the PyTorch module).
    user_table = jax.random.normal(k_ut, (num_users, K), jnp.float32) * 0.1
    item_table = jax.random.normal(k_it, (num_items, K), jnp.float32) * 0.1
    w1 = jax.random.normal(k_w1, (K, 2 * K), jnp.float32) * 0.1   # nn.Linear(2K, K).weight
    b1 = jax.random.normal(k_b1, (K,), jnp.float32) * 0.1         # nn.Linear(2K, K).bias
    w2 = jax.random.normal(k_w2, (1, K), jnp.float32) * 0.1       # nn.Linear(K, 1, bias=False).weight

    # Input: [B, 2] int32 of (user_idx, item_idx).
    u_ids = jax.random.randint(k_x, (B, 1), 0, num_users, jnp.int32)
    i_ids = jax.random.randint(jax.random.fold_in(k_x, 1), (B, 1), 0, num_items, jnp.int32)
    x = jnp.concatenate([u_ids, i_ids], axis=1)

    out, ue, ie = ncf_forward(x, user_table, item_table, w1, b1, w2)
    jax.block_until_ready((out, ue, ie))

    ref_out, ref_ue, ref_ie = ncf_reference(x, user_table, item_table, w1, b1, w2)
    assert out.shape == (B, 1) and ue.shape == (B, K) and ie.shape == (B, K)
    assert jnp.allclose(ue, ref_ue, atol=1e-6), "user embeddings mismatch"
    assert jnp.allclose(ie, ref_ie, atol=1e-6), "item embeddings mismatch"
    assert jnp.allclose(out, ref_out, atol=1e-5), "output mismatch"

    print("KERNEL_OK")
</pallas_src>

<mosaic_0001>
module attributes {stable_mosaic.version = 11 : i64} {
  func.func @ncf_kernel(%arg0: i32, %arg1: memref<8xi32, #tpu.memory_space<smem>>, %arg2: memref<8xi32, #tpu.memory_space<smem>>, %arg3: memref<32x32xf32, #tpu.memory_space<vmem>>, %arg4: memref<48x32xf32, #tpu.memory_space<vmem>>, %arg5: memref<64x32xf32, #tpu.memory_space<vmem>>, %arg6: memref<1x32xf32, #tpu.memory_space<vmem>>, %arg7: memref<1x32xf32, #tpu.memory_space<vmem>>, %arg8: memref<8x128xf32, #tpu.memory_space<vmem>>) attributes {dimension_semantics = [#tpu.dimension_semantics<parallel>], iteration_bounds = array<i64: 1>, scalar_prefetch = 2 : i64, scratch_operands = 0 : i64, tpu.core_type = #tpu.core_type<tc>, window_params = [{pipeline_mode = #tpu.pipeline_mode<synchronous>, transform_indices = @transform_0, window_bounds = array<i64: 32, 32>}, {pipeline_mode = #tpu.pipeline_mode<synchronous>, transform_indices = @transform_1, window_bounds = array<i64: 48, 32>}, {pipeline_mode = #tpu.pipeline_mode<synchronous>, transform_indices = @transform_2, window_bounds = array<i64: 64, 32>}, {pipeline_mode = #tpu.pipeline_mode<synchronous>, transform_indices = @transform_3, window_bounds = array<i64: 1, 32>}, {pipeline_mode = #tpu.pipeline_mode<synchronous>, transform_indices = @transform_4, window_bounds = array<i64: 1, 32>}, {transform_indices = @transform_5, window_bounds = array<i64: 8, 128>}]} {
    %c8_i32 = arith.constant 8 : i32
    %0 = arith.muli %arg0, %c8_i32 : i32
    %c0_i32 = arith.constant 0 : i32
    %1 = arith.addi %0, %c0_i32 : i32
    %2 = arith.index_cast %1 : i32 to index
    %3 = memref.load %arg1[%2] : memref<8xi32, #tpu.memory_space<smem>>
    %4 = arith.index_cast %3 : i32 to index
    %c0 = arith.constant 0 : index
    %5 = vector.load %arg3[%4, %c0] : memref<32x32xf32, #tpu.memory_space<vmem>>, vector<1x32xf32>
    %c0_0 = arith.constant 0 : index
    %c0_1 = arith.constant 0 : index
    %6 = vector.load %arg8[%c0_0, %c0_1] : memref<8x128xf32, #tpu.memory_space<vmem>>, vector<1x32xf32>
    tpu.vector_store %arg8[%c0_0, %c0_1], %5 {strides = array<i32>} : memref<8x128xf32, #tpu.memory_space<vmem>>, vector<1x32xf32>,
    %c0_i32_2 = arith.constant 0 : i32
    %7 = arith.addi %0, %c0_i32_2 : i32
    %8 = arith.index_cast %7 : i32 to index
    %9 = memref.load %arg2[%8] : memref<8xi32, #tpu.memory_space<smem>>
    %10 = arith.index_cast %9 : i32 to index
    %c0_3 = arith.constant 0 : index
    %11 = vector.load %arg4[%10, %c0_3] : memref<48x32xf32, #tpu.memory_space<vmem>>, vector<1x32xf32>
    %c0_4 = arith.constant 0 : index
    %c32 = arith.constant 32 : index
    %12 = vector.load %arg8[%c0_4, %c32] : memref<8x128xf32, #tpu.memory_space<vmem>>, vector<1x32xf32>
    tpu.vector_store %arg8[%c0_4, %c32], %11 {strides = array<i32>} : memref<8x128xf32, #tpu.memory_space<vmem>>, vector<1x32xf32>,
    %c1_i32 = arith.constant 1 : i32
    %13 = arith.addi %0, %c1_i32 : i32
    %14 = arith.index_cast %13 : i32 to index
    %15 = memref.load %arg1[%14] : memref<8xi32, #tpu.memory_space<smem>>
    %16 = arith.index_cast %15 : i32 to index
    %c0_5 = arith.constant 0 : index
    %17 = vector.load %arg3[%16, %c0_5] : memref<32x32xf32, #tpu.memory_space<vmem>>, vector<1x32xf32>
    %c1 = arith.constant 1 : index
    %c0_6 = arith.constant 0 : index
    %18 = vector.load %arg8[%c1, %c0_6] : memref<8x128xf32, #tpu.memory_space<vmem>>, vector<1x32xf32>
    tpu.vector_store %arg8[%c1, %c0_6], %17 {strides = array<i32>} : memref<8x128xf32, #tpu.memory_space<vmem>>, vector<1x32xf32>,
    %c1_i32_7 = arith.constant 1 : i32
    %19 = arith.addi %0, %c1_i32_7 : i32
    %20 = arith.index_cast %19 : i32 to index
    %21 = memref.load %arg2[%20] : memref<8xi32, #tpu.memory_space<smem>>
    %22 = arith.index_cast %21 : i32 to index
    %c0_8 = arith.constant 0 : index
    %23 = vector.load %arg4[%22, %c0_8] : memref<48x32xf32, #tpu.memory_space<vmem>>, vector<1x32xf32>
    %c1_9 = arith.constant 1 : index
    %c32_10 = arith.constant 32 : index
    %24 = vector.load %arg8[%c1_9, %c32_10] : memref<8x128xf32, #tpu.memory_space<vmem>>, vector<1x32xf32>
    tpu.vector_store %arg8[%c1_9, %c32_10], %23 {strides = array<i32>} : memref<8x128xf32, #tpu.memory_space<vmem>>, vector<1x32xf32>,
    %c2_i32 = arith.constant 2 : i32
    %25 = arith.addi %0, %c2_i32 : i32
    %26 = arith.index_cast %25 : i32 to index
    %27 = memref.load %arg1[%26] : memref<8xi32, #tpu.memory_space<smem>>
    %28 = arith.index_cast %27 : i32 to index
    %c0_11 = arith.constant 0 : index
    %29 = vector.load %arg3[%28, %c0_11] : memref<32x32xf32, #tpu.memory_space<vmem>>, vector<1x32xf32>
    %c2 = arith.constant 2 : index
    %c0_12 = arith.constant 0 : index
    %30 = vector.load %arg8[%c2, %c0_12] : memref<8x128xf32, #tpu.memory_space<vmem>>, vector<1x32xf32>
    tpu.vector_store %arg8[%c2, %c0_12], %29 {strides = array<i32>} : memref<8x128xf32, #tpu.memory_space<vmem>>, vector<1x32xf32>,
    %c2_i32_13 = arith.constant 2 : i32
    %31 = arith.addi %0, %c2_i32_13 : i32
    %32 = arith.index_cast %31 : i32 to index
    %33 = memref.load %arg2[%32] : memref<8xi32, #tpu.memory_space<smem>>
    %34 = arith.index_cast %33 : i32 to index
    %c0_14 = arith.constant 0 : index
    %35 = vector.load %arg4[%34, %c0_14] : memref<48x32xf32, #tpu.memory_space<vmem>>, vector<1x32xf32>
    %c2_15 = arith.constant 2 : index
    %c32_16 = arith.constant 32 : index
    %36 = vector.load %arg8[%c2_15, %c32_16] : memref<8x128xf32, #tpu.memory_space<vmem>>, vector<1x32xf32>
    tpu.vector_store %arg8[%c2_15, %c32_16], %35 {strides = array<i32>} : memref<8x128xf32, #tpu.memory_space<vmem>>, vector<1x32xf32>,
    %c3_i32 = arith.constant 3 : i32
    %37 = arith.addi %0, %c3_i32 : i32
    %38 = arith.index_cast %37 : i32 to index
    %39 = memref.load %arg1[%38] : memref<8xi32, #tpu.memory_space<smem>>
    %40 = arith.index_cast %39 : i32 to index
    %c0_17 = arith.constant 0 : index
    %41 = vector.load %arg3[%40, %c0_17] : memref<32x32xf32, #tpu.memory_space<vmem>>, vector<1x32xf32>
    %c3 = arith.constant 3 : index
    %c0_18 = arith.constant 0 : index
    %42 = vector.load %arg8[%c3, %c0_18] : memref<8x128xf32, #tpu.memory_space<vmem>>, vector<1x32xf32>
    tpu.vector_store %arg8[%c3, %c0_18], %41 {strides = array<i32>} : memref<8x128xf32, #tpu.memory_space<vmem>>, vector<1x32xf32>,
    %c3_i32_19 = arith.constant 3 : i32
    %43 = arith.addi %0, %c3_i32_19 : i32
    %44 = arith.index_cast %43 : i32 to index
    %45 = memref.load %arg2[%44] : memref<8xi32, #tpu.memory_space<smem>>
    %46 = arith.index_cast %45 : i32 to index
    %c0_20 = arith.constant 0 : index
    %47 = vector.load %arg4[%46, %c0_20] : memref<48x32xf32, #tpu.memory_space<vmem>>, vector<1x32xf32>
    %c3_21 = arith.constant 3 : index
    %c32_22 = arith.constant 32 : index
    %48 = vector.load %arg8[%c3_21, %c32_22] : memref<8x128xf32, #tpu.memory_space<vmem>>, vector<1x32xf32>
    tpu.vector_store %arg8[%c3_21, %c32_22], %47 {strides = array<i32>} : memref<8x128xf32, #tpu.memory_space<vmem>>, vector<1x32xf32>,
    %c4_i32 = arith.constant 4 : i32
    %49 = arith.addi %0, %c4_i32 : i32
    %50 = arith.index_cast %49 : i32 to index
    %51 = memref.load %arg1[%50] : memref<8xi32, #tpu.memory_space<smem>>
    %52 = arith.index_cast %51 : i32 to index
    %c0_23 = arith.constant 0 : index
    %53 = vector.load %arg3[%52, %c0_23] : memref<32x32xf32, #tpu.memory_space<vmem>>, vector<1x32xf32>
    %c4 = arith.constant 4 : index
    %c0_24 = arith.constant 0 : index
    %54 = vector.load %arg8[%c4, %c0_24] : memref<8x128xf32, #tpu.memory_space<vmem>>, vector<1x32xf32>
    tpu.vector_store %arg8[%c4, %c0_24], %53 {strides = array<i32>} : memref<8x128xf32, #tpu.memory_space<vmem>>, vector<1x32xf32>,
    %c4_i32_25 = arith.constant 4 : i32
    %55 = arith.addi %0, %c4_i32_25 : i32
    %56 = arith.index_cast %55 : i32 to index
    %57 = memref.load %arg2[%56] : memref<8xi32, #tpu.memory_space<smem>>
    %58 = arith.index_cast %57 : i32 to index
    %c0_26 = arith.constant 0 : index
    %59 = vector.load %arg4[%58, %c0_26] : memref<48x32xf32, #tpu.memory_space<vmem>>, vector<1x32xf32>
    %c4_27 = arith.constant 4 : index
    %c32_28 = arith.constant 32 : index
    %60 = vector.load %arg8[%c4_27, %c32_28] : memref<8x128xf32, #tpu.memory_space<vmem>>, vector<1x32xf32>
    tpu.vector_store %arg8[%c4_27, %c32_28], %59 {strides = array<i32>} : memref<8x128xf32, #tpu.memory_space<vmem>>, vector<1x32xf32>,
    %c5_i32 = arith.constant 5 : i32
    %61 = arith.addi %0, %c5_i32 : i32
    %62 = arith.index_cast %61 : i32 to index
    %63 = memref.load %arg1[%62] : memref<8xi32, #tpu.memory_space<smem>>
    %64 = arith.index_cast %63 : i32 to index
    %c0_29 = arith.constant 0 : index
    %65 = vector.load %arg3[%64, %c0_29] : memref<32x32xf32, #tpu.memory_space<vmem>>, vector<1x32xf32>
    %c5 = arith.constant 5 : index
    %c0_30 = arith.constant 0 : index
    %66 = vector.load %arg8[%c5, %c0_30] : memref<8x128xf32, #tpu.memory_space<vmem>>, vector<1x32xf32>
    tpu.vector_store %arg8[%c5, %c0_30], %65 {strides = array<i32>} : memref<8x128xf32, #tpu.memory_space<vmem>>, vector<1x32xf32>,
    %c5_i32_31 = arith.constant 5 : i32
    %67 = arith.addi %0, %c5_i32_31 : i32
    %68 = arith.index_cast %67 : i32 to index
    %69 = memref.load %arg2[%68] : memref<8xi32, #tpu.memory_space<smem>>
    %70 = arith.index_cast %69 : i32 to index
    %c0_32 = arith.constant 0 : index
    %71 = vector.load %arg4[%70, %c0_32] : memref<48x32xf32, #tpu.memory_space<vmem>>, vector<1x32xf32>
    %c5_33 = arith.constant 5 : index
    %c32_34 = arith.constant 32 : index
    %72 = vector.load %arg8[%c5_33, %c32_34] : memref<8x128xf32, #tpu.memory_space<vmem>>, vector<1x32xf32>
    tpu.vector_store %arg8[%c5_33, %c32_34], %71 {strides = array<i32>} : memref<8x128xf32, #tpu.memory_space<vmem>>, vector<1x32xf32>,
    %c6_i32 = arith.constant 6 : i32
    %73 = arith.addi %0, %c6_i32 : i32
    %74 = arith.index_cast %73 : i32 to index
    %75 = memref.load %arg1[%74] : memref<8xi32, #tpu.memory_space<smem>>
    %76 = arith.index_cast %75 : i32 to index
    %c0_35 = arith.constant 0 : index
    %77 = vector.load %arg3[%76, %c0_35] : memref<32x32xf32, #tpu.memory_space<vmem>>, vector<1x32xf32>
    %c6 = arith.constant 6 : index
    %c0_36 = arith.constant 0 : index
    %78 = vector.load %arg8[%c6, %c0_36] : memref<8x128xf32, #tpu.memory_space<vmem>>, vector<1x32xf32>
    tpu.vector_store %arg8[%c6, %c0_36], %77 {strides = array<i32>} : memref<8x128xf32, #tpu.memory_space<vmem>>, vector<1x32xf32>,
    %c6_i32_37 = arith.constant 6 : i32
    %79 = arith.addi %0, %c6_i32_37 : i32
    %80 = arith.index_cast %79 : i32 to index
    %81 = memref.load %arg2[%80] : memref<8xi32, #tpu.memory_space<smem>>
    %82 = arith.index_cast %81 : i32 to index
    %c0_38 = arith.constant 0 : index
    %83 = vector.load %arg4[%82, %c0_38] : memref<48x32xf32, #tpu.memory_space<vmem>>, vector<1x32xf32>
    %c6_39 = arith.constant 6 : index
    %c32_40 = arith.constant 32 : index
    %84 = vector.load %arg8[%c6_39, %c32_40] : memref<8x128xf32, #tpu.memory_space<vmem>>, vector<1x32xf32>
    tpu.vector_store %arg8[%c6_39, %c32_40], %83 {strides = array<i32>} : memref<8x128xf32, #tpu.memory_space<vmem>>, vector<1x32xf32>,
    %c7_i32 = arith.constant 7 : i32
    %85 = arith.addi %0, %c7_i32 : i32
    %86 = arith.index_cast %85 : i32 to index
    %87 = memref.load %arg1[%86] : memref<8xi32, #tpu.memory_space<smem>>
    %88 = arith.index_cast %87 : i32 to index
    %c0_41 = arith.constant 0 : index
    %89 = vector.load %arg3[%88, %c0_41] : memref<32x32xf32, #tpu.memory_space<vmem>>, vector<1x32xf32>
    %c7 = arith.constant 7 : index
    %c0_42 = arith.constant 0 : index
    %90 = vector.load %arg8[%c7, %c0_42] : memref<8x128xf32, #tpu.memory_space<vmem>>, vector<1x32xf32>
    tpu.vector_store %arg8[%c7, %c0_42], %89 {strides = array<i32>} : memref<8x128xf32, #tpu.memory_space<vmem>>, vector<1x32xf32>,
    %c7_i32_43 = arith.constant 7 : i32
    %91 = arith.addi %0, %c7_i32_43 : i32
    %92 = arith.index_cast %91 : i32 to index
    %93 = memref.load %arg2[%92] : memref<8xi32, #tpu.memory_space<smem>>
    %94 = arith.index_cast %93 : i32 to index
    %c0_44 = arith.constant 0 : index
    %95 = vector.load %arg4[%94, %c0_44] : memref<48x32xf32, #tpu.memory_space<vmem>>, vector<1x32xf32>
    %c7_45 = arith.constant 7 : index
    %c32_46 = arith.constant 32 : index
    %96 = vector.load %arg8[%c7_45, %c32_46] : memref<8x128xf32, #tpu.memory_space<vmem>>, vector<1x32xf32>
    tpu.vector_store %arg8[%c7_45, %c32_46], %95 {strides = array<i32>} : memref<8x128xf32, #tpu.memory_space<vmem>>, vector<1x32xf32>,
    %c0_47 = arith.constant 0 : index
    %c0_48 = arith.constant 0 : index
    %97 = vector.load %arg8[%c0_47, %c0_48] : memref<8x128xf32, #tpu.memory_space<vmem>>, vector<8x64xf32>
    %c0_49 = arith.constant 0 : index
    %c0_50 = arith.constant 0 : index
    %98 = vector.load %arg5[%c0_49, %c0_50] : memref<64x32xf32, #tpu.memory_space<vmem>>, vector<64x32xf32>
    %cst = arith.constant dense<0.000000e+00> : vector<8x32xf32>
    %99 = tpu.matmul %97, %98, %cst {dimension_numbers = #tpu.dot_dimension_numbers<[1], [0], [0], [1], [0, 0, 1, 1], [], []>} : vector<8x64xf32>, vector<64x32xf32>, vector<8x32xf32> -> vector<8x32xf32>
    %c0_51 = arith.constant 0 : index
    %c0_52 = arith.constant 0 : index
    %100 = vector.load %arg6[%c0_51, %c0_52] : memref<1x32xf32, #tpu.memory_space<vmem>>, vector<1x32xf32>
    %101 = vector.broadcast %100 : vector<1x32xf32> to vector<8x32xf32>
    %102 = arith.addf %99, %101 : vector<8x32xf32>
    %cst_53 = arith.constant 0.000000e+00 : f32
    %103 = vector.broadcast %cst_53 : f32 to vector<8x32xf32>
    %104 = arith.maximumf %102, %103 : vector<8x32xf32>
    %c0_54 = arith.constant 0 : index
    %c0_55 = arith.constant 0 : index
    %105 = vector.load %arg7[%c0_54, %c0_55] : memref<1x32xf32, #tpu.memory_space<vmem>>, vector<1x32xf32>
    %106 = vector.broadcast %105 : vector<1x32xf32> to vector<8x32xf32>
    %107 = arith.mulf %104, %106 : vector<8x32xf32>
    %cst_56 = arith.constant dense<0.000000e+00> : vector<8xf32>
    %108 = vector.multi_reduction <add>, %107, %cst_56 [1] : vector<8x32xf32> to vector<8xf32>
    %109 = vector.shape_cast %108 : vector<8xf32> to vector<8x1xf32>
    %c0_57 = arith.constant 0 : index
    %c64 = arith.constant 64 : index
    %110 = vector.load %arg8[%c0_57, %c64] : memref<8x128xf32, #tpu.memory_space<vmem>>, vector<8x1xf32>
    tpu.vector_store %arg8[%c0_57, %c64], %109 {strides = array<i32>} : memref<8x128xf32, #tpu.memory_space<vmem>>, vector<8x1xf32>,
    %cst_58 = arith.constant 0.000000e+00 : f32
    %111 = vector.broadcast %cst_58 : f32 to vector<8x63xf32>
    %c0_59 = arith.constant 0 : index
    %c65 = arith.constant 65 : index
    %112 = vector.load %arg8[%c0_59, %c65] : memref<8x128xf32, #tpu.memory_space<vmem>>, vector<8x63xf32>
    tpu.vector_store %arg8[%c0_59, %c65], %111 {strides = array<i32>} : memref<8x128xf32, #tpu.memory_space<vmem>>, vector<8x63xf32>,
    return
  }
  func.func @transform_0(%arg0: i32, %arg1: memref<8xi32, #tpu.memory_space<smem>>, %arg2: memref<8xi32, #tpu.memory_space<smem>>) -> (i32, i32) {
    %c0_i32 = arith.constant 0 : i32
    %c0_i32_0 = arith.constant 0 : i32
    %c0_i32_1 = arith.constant 0 : i32
    return %c0_i32, %c0_i32_0 : i32, i32
  }
  func.func @transform_1(%arg0: i32, %arg1: memref<8xi32, #tpu.memory_space<smem>>, %arg2: memref<8xi32, #tpu.memory_space<smem>>) -> (i32, i32) {
    %c0_i32 = arith.constant 0 : i32
    %c0_i32_0 = arith.constant 0 : i32
    %c0_i32_1 = arith.constant 0 : i32
    return %c0_i32, %c0_i32_0 : i32, i32
  }
  func.func @transform_2(%arg0: i32, %arg1: memref<8xi32, #tpu.memory_space<smem>>, %arg2: memref<8xi32, #tpu.memory_space<smem>>) -> (i32, i32) {
    %c0_i32 = arith.constant 0 : i32
    %c0_i32_0 = arith.constant 0 : i32
    %c0_i32_1 = arith.constant 0 : i32
    return %c0_i32, %c0_i32_0 : i32, i32
  }
  func.func @transform_3(%arg0: i32, %arg1: memref<8xi32, #tpu.memory_space<smem>>, %arg2: memref<8xi32, #tpu.memory_space<smem>>) -> (i32, i32) {
    %c0_i32 = arith.constant 0 : i32
    %c0_i32_0 = arith.constant 0 : i32
    %c0_i32_1 = arith.constant 0 : i32
    return %c0_i32, %c0_i32_0 : i32, i32
  }
  func.func @transform_4(%arg0: i32, %arg1: memref<8xi32, #tpu.memory_space<smem>>, %arg2: memref<8xi32, #tpu.memory_space<smem>>) -> (i32, i32) {
    %c0_i32 = arith.constant 0 : i32
    %c0_i32_0 = arith.constant 0 : i32
    %c0_i32_1 = arith.constant 0 : i32
    return %c0_i32, %c0_i32_0 : i32, i32
  }
  func.func @transform_5(%arg0: i32, %arg1: memref<8xi32, #tpu.memory_space<smem>>, %arg2: memref<8xi32, #tpu.memory_space<smem>>) -> (i32, i32) {
    %c0_i32 = arith.constant 0 : i32
    %c0_i32_0 = arith.constant 0 : i32
    return %arg0, %c0_i32 : i32, i32
  }
}

</mosaic_0001>

<bundles_post_ra>
// kernel: tpu_custom_call.1
= control target key start
LH: loop header
LB: loop body
LE: loop exit
PB: predicated region body
PF: predicated region fallthrough
CT: control target
= control target key end

     0   :  { %s592_s0 = inlined_call_operand.vmem [shape: s32[8], index: 0, kind: input, shape index: {}]   ;;  %s593_s2 = inlined_call_operand.vmem [shape: f32[32,32], index: 2, kind: input, shape index: {}]   ;;  %s594_s3 = inlined_call_operand.vmem [shape: f32[48,32], index: 3, kind: input, shape index: {}]   ;;  %s595_s4 = inlined_call_operand.vmem [shape: f32[64,32], index: 4, kind: input, shape index: {}]   ;;  %s596_s5 = inlined_call_operand.vmem [shape: f32[1,32], index: 5, kind: input, shape index: {}]   ;;  %s597_s6 = inlined_call_operand.vmem [shape: f32[1,32], index: 6, kind: input, shape index: {}]   ;;  %s598_s7 = inlined_call_operand.hbm [shape: f32[8,128], index: 7, kind: output, shape index: {}]   ;;  %s599_s1 = inlined_call_operand.vmem [shape: s32[8], index: 1, kind: input, shape index: {}]  }
   0x1   :  { %s12_s26 = sshll.u32 %s592_s0, 4  ;;  %s16_s29 = sshll.u32 %s599_s1, 4  ;;  %s13_s26 = int_to_ptr.vmem [resolvable:$true] %s12_s26  ;;  %s17_s29 = int_to_ptr.vmem [resolvable:$true] %s16_s29 }
   0x2   :  { %s340_s30 = scalar_lea.vmem %s13_s26, 16  ;;  %p345_p1 = scmp.lt.s32.totalorder %s13_s26, %s13_s26 }
   0x3   :  { %p341_p0 = scmp.ne.s32.totalorder %s13_s26, %s340_s30  ;;  %p346_p2 = scmp.lt.s32.totalorder %s340_s30, %s340_s30 }
   0x5   :  { %p347_p3 = por %p346_p2, %p345_p1 }
   0x7   :  { %p348_p4 = pnand %p347_p3, %p341_p0 }
   0x9   :  { %351 = shalt.err (!%p348_p4)  }
   0xa   :  { %s390_s8 = smov [#allocation3]   ;;  %s352_s9 = scalar_lea.vmem %s17_s29, 16 }
   0xb   :  { %15 = dma.vmem_to_smem %s13_s26, 16, %s390_s8, [#allocation2] }
   0xc   :  { %p353_p5 = scmp.ne.s32.totalorder %s17_s29, %s352_s9  ;;  %p357_p6 = scmp.lt.s32.totalorder %s17_s29, %s17_s29 }
   0xd   :  { %p358_p7 = scmp.lt.s32.totalorder %s352_s9, %s352_s9 }
   0xf   :  { %p359_p8 = por %p358_p7, %p357_p6 }
  0x11   :  { %p360_p9 = pnand %p359_p8, %p353_p5 }
  0x13   :  { %363 = shalt.err (!%p360_p9)  }
  0x14   :  { %s391_s0 = smov [#allocation4]  }
  0x15   :  { %19 = dma.vmem_to_smem %s17_s29, 16, %s391_s0, [#allocation2] }
  0x16   :  { %386 = dma.done.wait [#allocation2], 32 }
  0x17   :  { %387 = vsyncadd [#allocation2], 4294967264 }
  0x18   :  { %21 = sfence }
  0x19   :  { %s279_s1 = sld [smem:[#allocation4 + $0x2]]  ;;  %s443_s10 = sld [smem:[#allocation4]]  ;;  %v392_v0 = vmov 0.0|0.0   ;;  %v140_v1 = vld [vmem:[%s595_s4] sm:$0xff]  ;;  %v141_v2 = vld [vmem:[%s595_s4 + $0x8] sm:$0xff]  ;;  %v142_v4 = vld [vmem:[%s595_s4 + $0x10] sm:$0xff] }
  0x1a   :  { %s445_s11 = sld [smem:[#allocation4 + $0x3]]  ;;  %321 = vmatprep.subr.bf16.mxu0 %v392_v0  ;;  %s453_s16 = sld [smem:[#allocation4 + $0x1]]  ;;  %v322_v3 = vpack.c.bf16 %v141_v2, %v140_v1  ;;  %v143_v5 = vld [vmem:[%s595_s4 + $0x18] sm:$0xff] }
  0x1b   :  { %s455_s17 = sld [smem:[#allocation4 + $0x5]]  ;;  %s463_s22 = sld [smem:[#allocation4 + $0x4]] }
  0x1c   :  { %s465_s23 = sld [smem:[#allocation4 + $0x7]] }
  0x1d   :  { %22 = vsyncpa [#allocation6], 0  ;;  %s467_s24 = sld [smem:[#allocation4 + $0x6]]  ;;  %s469_s25 = sld [smem:[#allocation3 + $0x2]]  ;;  %323 = vmatpush3.bf16.msra.mxu0 %v322_v3  ;;  %v325_v6 = vpack.c.bf16 %v143_v5, %v142_v4  ;;  %v144_v7 = vld [vmem:[%s595_s4 + $0x20] sm:$0xff]  ;;  %v145_v8 = vld [vmem:[%s595_s4 + $0x28] sm:$0xff] }
  0x1e   :  { %s471_s26 = sld [smem:[#allocation3]]  ;;  %s473_s27 = sld [smem:[#allocation3 + $0x3]]  ;;  %324 = vmatprep.subr.bf16.mxu0 %v392_v0  ;;  %v328_v11 = vpack.c.bf16 %v145_v8, %v144_v7  ;;  %vm37_vm0 = vcmask 253952   ;;  %v146_v13 = vld [vmem:[%s595_s4 + $0x30] sm:$0xff]  ;;  %v147_v14 = vld [vmem:[%s595_s4 + $0x38] sm:$0xff]  ;;  %vm394_vm1 = vmmov 0  }
  0x1f   :  { %s67_s30 = scalar_lea.vmem %s594_s3, %s279_s1  ;;  %s478_s8 = sld [smem:[#allocation3 + $0x1]]  ;;  %v395_v16 = vmov 0.0   ;;  %v331_v21 = vpack.c.bf16 %v147_v14, %v146_v13  ;;  %vm46_vm2 = vcmask 516352   ;;  %vm155_vm3 = vcmask 523264   ;;  %v290_v39 = vld [vmem:[%s596_s5] ss:$0 sm:$0xff] }
  0x20   :  { %v68_v9 = vld [vmem:[%s67_s30] sm:$0x1]  ;;  %s40_s18 = scalar_lea.vmem %s594_s3, %s443_s10  ;;  %s80_s1 = scalar_lea.vmem %s594_s3, %s445_s11  ;;  %318 = vmatprep.mubr.msk.f32.mxu0 %vm394_vm1, %v395_v16  ;;  %vm238_vm4 = vcmask 261120   ;;  %vm242_vm5 = vcmask 531968   ;;  %vm244_vm6 = vcmask 1048072  }
  0x21   :  { %s393_s21 = smov 32   ;;  %v41_v10 = vld [vmem:[%s40_s18] sm:$0x1]  ;;  %s54_s9 = scalar_lea.vmem %s594_s3, %s453_s16  ;;  %326 = vmatpush3.bf16.msra.mxu0 %v325_v6 }
  0x22   :  { %70 = vrot.lane.b32.xlu1 %v68_v9, %s393_s21  ;;  %s106_s12 = scalar_lea.vmem %s594_s3, %s455_s17  ;;  %43 = vrot.lane.b32.xlu0 %v41_v10, %s393_s21  ;;  %v81_v12 = vld [vmem:[%s80_s1] sm:$0x1]  ;;  %s93_s15 = scalar_lea.vmem %s594_s3, %s463_s22 }
  0x23   :  { %327 = vmatprep.subr.bf16.mxu0 %v392_v0  ;;  %v55_v15 = vld [vmem:[%s54_s9] sm:$0x1]  ;;  %s63_s20 = scalar_lea.vmem %s593_s2, %s469_s25  ;;  %s132_s13 = scalar_lea.vmem %s594_s3, %s465_s23 }
  0x24   :  { %v107_v17 = vld [vmem:[%s106_s12] sm:$0x1]  ;;  %s35_s29 = scalar_lea.vmem %s593_s2, %s471_s26  ;;  %s76_s0 = scalar_lea.vmem %s593_s2, %s473_s27 }
  0x25   :  { %v64_v18 = vld [vmem:[%s63_s20] sm:$0x1]  ;;  %s50_s30 = scalar_lea.vmem %s593_s2, %s478_s8  ;;  %s284_s12 = sld [smem:[#allocation3 + $0x5]]  ;;  %329 = vmatpush3.bf16.msra.mxu0 %v328_v11 }
  0x26   :  { %83 = vrot.lane.b32.xlu1 %v81_v12, %s393_s21  ;;  %65 = vst.msk [vmem:[#allocation5 + $0x2] sm:$0x1] %vm37_vm0, %v64_v18  ;;  %v36_v19 = vld [vmem:[%s35_s29] sm:$0x1]  ;;  %57 = vrot.lane.b32.xlu0 %v55_v15, %s393_s21  ;;  %s282_s26 = sld [smem:[#allocation3 + $0x4]]  ;;  %s288_s27 = sld [smem:[#allocation3 + $0x7]] }
  0x27   :  { %v77_v20 = vld [vmem:[%s76_s0] sm:$0x1]  ;;  %38 = vst.msk [vmem:[#allocation5] sm:$0x1] %vm37_vm0, %v36_v19  ;;  %330 = vmatprep.subr.bf16.mxu0 %v392_v0  ;;  %s286_s8 = sld [smem:[#allocation3 + $0x6]]  ;;  %s119_s17 = scalar_lea.vmem %s594_s3, %s467_s24 }
  0x28   :  { %78 = vst.msk [vmem:[#allocation5 + $0x3] sm:$0x1] %vm37_vm0, %v77_v20  ;;  %v51_v22 = vld [vmem:[%s50_s30] sm:$0x1]  ;;  %s396_s25 = smov [#allocation5]  }
  0x29   :  { %v94_v23 = vld [vmem:[%s93_s15] sm:$0x1]  ;;  %52 = vst.msk [vmem:[#allocation5 + $0x1] sm:$0x1] %vm37_vm0, %v51_v22  ;;  %332 = vmatpush3.bf16.msra.mxu0 %v331_v21  ;;  %s252_s30 = sshll.u32 %s396_s25, 4  ;;  %s253_s30 = int_to_ptr.vmem [resolvable:$true] %s252_s30 }
  0x2a   :  { %109 = vrot.lane.b32.xlu1 %v107_v17, %s393_s21  ;;  %96 = vrot.lane.b32.xlu0 %v94_v23, %s393_s21  ;;  %v133_v24 = vld [vmem:[%s132_s13] sm:$0x1]  ;;  %s364_s5 = scalar_lea.vmem %s253_s30, 128  ;;  %p369_p11 = scmp.lt.s32.totalorder %s253_s30, %s253_s30 }
  0x2b   :  { %v120_v25 = vld [vmem:[%s119_s17] sm:$0x1]  ;;  %s102_s19 = scalar_lea.vmem %s593_s2, %s284_s12  ;;  %p365_p10 = scmp.ne.s32.totalorder %s253_s30, %s364_s5 }
  0x2c   :  { %v103_v26 = vld [vmem:[%s102_s19] sm:$0x1]  ;;  %s89_s1 = scalar_lea.vmem %s593_s2, %s282_s26  ;;  %s128_s3 = scalar_lea.vmem %s593_s2, %s288_s27 }
  0x2d   :  { %104 = vst.msk [vmem:[#allocation5 + $0x5] sm:$0x1] %vm37_vm0, %v103_v26  ;;  %v90_v27 = vld [vmem:[%s89_s1] sm:$0x1]  ;;  %s115_s9 = scalar_lea.vmem %s593_s2, %s286_s8  ;;  %p370_p12 = scmp.lt.s32.totalorder %s364_s5, %s364_s5 }
  0x2e   :  { %135 = vrot.lane.b32.xlu1 %v133_v24, %s393_s21  ;;  %v129_v28 = vld [vmem:[%s128_s3] sm:$0x1]  ;;  %122 = vrot.lane.b32.xlu0 %v120_v25, %s393_s21  ;;  %91 = vst.msk [vmem:[#allocation5 + $0x4] sm:$0x1] %vm37_vm0, %v90_v27 }
  0x2f   :  { %130 = vst.msk [vmem:[#allocation5 + $0x7] sm:$0x1] %vm37_vm0, %v129_v28  ;;  %v116_v29 = vld [vmem:[%s115_s9] sm:$0x1]  ;;  %p371_p13 = por %p370_p12, %p369_p11 }
  0x30   :  { %117 = vst.msk [vmem:[#allocation5 + $0x6] sm:$0x1] %vm37_vm0, %v116_v29  ;;  %v292_v43 = vld [vmem:[%s597_s6] ss:$0 sm:$0xff] }
  0x31   :  { %p372_p0 = pnand %p371_p13, %p365_p10 }
  0x94   :  { %v71_v30 = vpop.permute.xlu1 %70  ;;  %v44_v31 = vpop.permute.xlu0 %43 }
  0x95   :  { %73 = vst.msk [vmem:[#allocation5 + $0x2] sm:$0x1] %vm46_vm2, %v71_v30  ;;  %47 = vst.msk [vmem:[#allocation5] sm:$0x1] %vm46_vm2, %v44_v31 }
  0x98   :  { %v84_v32 = vpop.permute.xlu1 %83  ;;  %v58_v33 = vpop.permute.xlu0 %57 }
  0x99   :  { %86 = vst.msk [vmem:[#allocation5 + $0x3] sm:$0x1] %vm46_vm2, %v84_v32  ;;  %60 = vst.msk [vmem:[#allocation5 + $0x1] sm:$0x1] %vm46_vm2, %v58_v33 }
  0x9c   :  { %v110_v34 = vpop.permute.xlu1 %109  ;;  %v97_v35 = vpop.permute.xlu0 %96 }
  0x9d   :  { %112 = vst.msk [vmem:[#allocation5 + $0x5] sm:$0x1] %vm46_vm2, %v110_v34  ;;  %99 = vst.msk [vmem:[#allocation5 + $0x4] sm:$0x1] %vm46_vm2, %v97_v35 }
  0xa0   :  { %v136_v36 = vpop.permute.xlu1 %135  ;;  %v123_v37 = vpop.permute.xlu0 %122 }
  0xa1   :  { %138 = vst.msk [vmem:[#allocation5 + $0x7] sm:$0x1] %vm46_vm2, %v136_v36  ;;  %125 = vst.msk [vmem:[#allocation5 + $0x6] sm:$0x1] %vm46_vm2, %v123_v37 }
  0xa8   :  { %v139_v38 = vld [vmem:[#allocation5] sm:$0xff] }
  0xa9   :  { %319 = vmatmul.mubr.msk.f32.vlgmr.msra.gmra.mrb[0].mxu0 %vm155_vm3, %v139_v38 }
 0x17c   :  { %v225_v40 = vpop.f32.mrb[0].mxu0 }
 0x17d   :  { %v226_v41 = vadd.f32 %v290_v39, %v225_v40  ;;  %v320_v42 = vpop.f32.mrb[1].mxu0 }
 0x17f   :  { %v229_v44 = vmax.f32 %v226_v41, 0.0 }
 0x181   :  { %v237_v45 = vmul.f32 %v292_v43, %v229_v44 }
 0x183   :  { %v239_v46 = vsel %vm238_vm4, %v237_v45, 0.0 }
 0x184   :  { %240 = vadd.xlane.f32.xlu0 %v239_v46 }
 0x211   :  { %v241_v47 = vpop.xlane.xlu0 %240 }
 0x212   :  { %243 = vst.msk [vmem:[#allocation5] sm:$0xff] %vm242_vm5, %v241_v47 }
 0x213   :  { %245 = vst.msk [vmem:[#allocation5] sm:$0xff] %vm244_vm6, %v395_v16 }
 0x214   :  { %375 = shalt.err (!%p372_p0)
}
 0x215   :  { %s376_s26 = scalar_lea.hbm %s598_s7, 128 }
 0x216   :  { %p377_p1 = scmp.ne.s32.totalorder %s598_s7, %s376_s26  ;;  %p380_p2 = scmp.lt.u32.totalorder %s376_s26, %s598_s7 }
 0x218   :  { %p382_p3 = pnand %p380_p2, %p377_p1 }
 0x21a   :  { %385 = shalt.err (!%p382_p3)
}
 0x21b   :  { %255 = dma.vmem_to_hbm [thread:$0]  %s253_s30, 128, %s598_s7, [#allocation6]  }
 0x21c   :  { %388 = dma.done.wait [#allocation6], 128  }
 0x21d   :  { %389 = vsyncadd [#allocation6], 4294967168 }
 0x21e   :  { %259 = vsyncpa [#allocation6], 1 }

</bundles_post_ra>
